<compile_context>
chip_gen: v7x
topology: tpu7x:2x2x1
jax: 0.10.0
libtpu: 0.0.40
codegen_flags: <defaults>
</compile_context>

<pallas_src>
import functools

import jax
import jax.numpy as jnp
from jax.experimental import pallas as pl
from jax.experimental.pallas import tpu as pltpu


def _ce_kernel(targets_ref, x_ref, out_ref, acc_ref, *, l_valid, bl, mask_last):
    """grid = (N, num_l_tiles)

    targets_ref : SMEM int32[N]            (scalar prefetch)
    x_ref       : VMEM [C, bl, 128]        (batch dim squeezed, native dtype)
    out_ref     : VMEM f32[1, 1]           (per-sample partial sum)
    acc_ref     : VMEM f32[bl, 128]        (elementwise accumulator scratch)
    """
    n = pl.program_id(0)
    li = pl.program_id(1)
    num_l = pl.num_programs(1)

    x = x_ref[...].astype(jnp.float32)                        # (C, bl, 128)

    # numerically stable log-sum-exp over the channel axis.  axis 0 is a
    # leading (non-tiled) dim, so this is a cross-vreg VALU max/add and every
    # vreg is fully packed (bl x 128).
    m = jnp.max(x, axis=0)                                     # (bl, 128)
    lse = m + jnp.log(jnp.sum(jnp.exp(x - m[None]), axis=0))   # (bl, 128)

    # target-channel slab: single dynamic leading-dim read, no one-hot mask
    t = targets_ref[n]
    x_t = x_ref[t].astype(jnp.float32)                         # (bl, 128)

    contrib = lse - x_t                                        # (bl, 128)

    @pl.when(li == 0)
    def _():
        acc_ref[...] = jnp.zeros_like(acc_ref)

    if mask_last:
        # spatial padding / ragged last block only lives in the final L tile,
        # so the iota/compare/select runs once per sample, not on every tile.
        @pl.when(li < num_l - 1)
        def _():
            acc_ref[...] += contrib

        @pl.when(li == num_l - 1)
        def _():
            rows = jax.lax.broadcasted_iota(jnp.int32, (bl, 128), 0)
            cols = jax.lax.broadcasted_iota(jnp.int32, (bl, 128), 1)
            pos = (li * bl + rows) * 128 + cols
            acc_ref[...] += jnp.where(pos < l_valid, contrib, 0.0)
    else:
        acc_ref[...] += contrib

    @pl.when(li == num_l - 1)
    def _():
        # single cross-lane/sublane (XLU) reduce per sample, once at the end
        out_ref[...] = jnp.sum(acc_ref[...]).reshape(1, 1)


@jax.jit
def cross_entropy_loss(inputs, targets):
    """inputs: (N, C, *spatial) float (any float dtype); targets: (N,) int in [0, C)."""
    N, C = inputs.shape[0], inputs.shape[1]
    x = inputs.reshape(N, C, -1)               # keep native dtype; kernel casts
    L = x.shape[2]
    # clamp: an OOB target would otherwise be an unchecked VMEM read
    targets = jnp.clip(targets.astype(jnp.int32), 0, C - 1)

    # Pack the spatial axis into full (sublane, lane) vregs:
    # (N, C, L) -> (N, C, L128, 128).  Splitting the minor-most dim is a
    # layout-preserving reshape, i.e. free (no HBM copy) when L % 128 == 0.
    L128 = pl.cdiv(L, 128)
    pad = L128 * 128 - L
    if pad:
        # TODO(synk): only hit when L % 128 != 0; costs one HBM copy of x.
        x = jnp.pad(x, ((0, 0), (0, 0), (0, pad)))
    x = x.reshape(N, C, L128, 128)

    itemsize = jnp.dtype(x.dtype).itemsize
    # ~4 MiB input tile: amortizes the per-grid-step overhead on all
    # generations while (double-buffered input + in-kernel f32 temporaries +
    # accumulator) stays well inside v7x's 64 MiB physical VMEM.
    target_block_bytes = 4 * 1024 * 1024
    bl = max(8, (target_block_bytes // (C * 128 * itemsize)) // 8 * 8)
    if bl >= L128:
        bl = L128            # full extent: no (8, .) divisibility requirement
    num_l = pl.cdiv(L128, bl)
    # no wrapper padding to the tile multiple: the grid is cdiv-sized and the
    # ragged / zero-padded tail is masked in-kernel on the last tile only
    mask_last = (num_l * bl * 128) != L

    kernel = functools.partial(_ce_kernel, l_valid=L, bl=bl, mask_last=mask_last)

    out = pl.pallas_call(
        kernel,
        out_shape=jax.ShapeDtypeStruct((N, 1, 1), jnp.float32),
        grid_spec=pltpu.PrefetchScalarGridSpec(
            num_scalar_prefetch=1,
            grid=(N, num_l),
            in_specs=[
                # one (C, bl, 128) slab per (sample, L-tile); batch dim squeezed
                pl.BlockSpec((None, C, bl, 128), lambda n, l, tgt: (n, 0, l, 0)),
            ],
            out_specs=pl.BlockSpec((None, 1, 1), lambda n, l, tgt: (n, 0, 0)),
            scratch_shapes=[pltpu.VMEM((bl, 128), jnp.float32)],
        ),
        compiler_params=pltpu.CompilerParams(
            # batch axis parallel (megacore on v7x); L-tile reduction axis last
            # and "arbitrary" (scratch-carried accumulator).
            # TODO(synk): for N == 1 on v7x, split the L range over an extra
            # leading "parallel" axis so both TensorCores stay busy.
            dimension_semantics=("parallel", "arbitrary"),
            vmem_limit_bytes=48 * 1024 * 1024,
        ),
        cost_estimate=pl.CostEstimate(
            flops=int(6 * N * C * L128 * 128),
            transcendentals=int(N * C * L128 * 128),
            bytes_accessed=int(N * C * L128 * 128 * itemsize + 8 * N),
        ),
    )(targets, x)

    partial_sums = out[:, 0, 0]                       # (N,) per-sample sums
    return jnp.sum(partial_sums) / jnp.float32(N * L)


def _reference(inputs, targets):
    N, C = inputs.shape[0], inputs.shape[1]
    x = inputs.reshape(N, C, -1).astype(jnp.float32)
    L = x.shape[2]
    lp = jax.nn.log_softmax(x, axis=1)                                  # (N, C, L)
    onehot = jax.nn.one_hot(targets, C, dtype=jnp.float32)[:, :, None]  # (N, C, 1)
    loss = jnp.sum(jnp.mean(-onehot * lp, axis=0))
    return loss / L


if __name__ == "__main__":
    key = jax.random.PRNGKey(0)
    k1, k2 = jax.random.split(key)

    N, C, H, W = 2, 4, 16, 16
    inputs = jax.random.normal(k1, (N, C, H, W), dtype=jnp.float32)
    targets = jax.random.randint(k2, (N,), 0, C, dtype=jnp.int32)

    loss = cross_entropy_loss(inputs, targets)
    jax.block_until_ready(loss)

    ref = _reference(inputs, targets)
    assert jnp.allclose(loss, ref, rtol=1e-5, atol=1e-5), (loss, ref)

    print("KERNEL_OK")
</pallas_src>

<mosaic_0001>
module attributes {stable_mosaic.version = 11 : i64} {
  func.func @_ce_kernel(%arg0: i32, %arg1: i32, %arg2: memref<2xi32, #tpu.memory_space<smem>>, %arg3: memref<1x4x2x128xf32, #tpu.memory_space<vmem>>, %arg4: memref<1x1x1xf32, #tpu.memory_space<vmem>>, %arg5: memref<2x128xf32, #tpu.memory_space<vmem>>) attributes {dimension_semantics = [#tpu.dimension_semantics<parallel>, #tpu.dimension_semantics<arbitrary>], iteration_bounds = array<i64: 2, 1>, scalar_prefetch = 1 : i64, scratch_operands = 1 : i64, tpu.core_type = #tpu.core_type<tc>, window_params = [{transform_indices = @transform_0, window_bounds = array<i64: 1, 4, 2, 128>}, {transform_indices = @transform_1, window_bounds = array<i64: 1, 1, 1>}]} {
    %c0 = arith.constant 0 : index
    %c0_0 = arith.constant 0 : index
    %c0_1 = arith.constant 0 : index
    %c0_2 = arith.constant 0 : index
    %0 = vector.load %arg3[%c0, %c0_0, %c0_1, %c0_2] : memref<1x4x2x128xf32, #tpu.memory_space<vmem>>, vector<1x4x2x128xf32>
    %1 = vector.shape_cast %0 : vector<1x4x2x128xf32> to vector<4x2x128xf32>
    %cst = arith.constant dense<0xFF800000> : vector<2x128xf32>
    %2 = vector.multi_reduction <maximumf>, %1, %cst [0] : vector<4x2x128xf32> to vector<2x128xf32>
    %3 = vector.shape_cast %2 : vector<2x128xf32> to vector<1x2x128xf32>
    %4 = vector.broadcast %3 : vector<1x2x128xf32> to vector<4x2x128xf32>
    %5 = arith.subf %1, %4 : vector<4x2x128xf32>
    %6 = math.exp %5 : vector<4x2x128xf32>
    %cst_3 = arith.constant dense<0.000000e+00> : vector<2x128xf32>
    %7 = vector.multi_reduction <add>, %6, %cst_3 [0] : vector<4x2x128xf32> to vector<2x128xf32>
    %8 = math.log %7 : vector<2x128xf32>
    %9 = arith.addf %2, %8 : vector<2x128xf32>
    %10 = arith.index_cast %arg0 : i32 to index
    %11 = memref.load %arg2[%10] : memref<2xi32, #tpu.memory_space<smem>>
    %c0_4 = arith.constant 0 : index
    %12 = arith.index_cast %11 : i32 to index
    %c0_5 = arith.constant 0 : index
    %c0_6 = arith.constant 0 : index
    %13 = vector.load %arg3[%c0_4, %12, %c0_5, %c0_6] : memref<1x4x2x128xf32, #tpu.memory_space<vmem>>, vector<1x1x2x128xf32>
    %14 = vector.shape_cast %13 : vector<1x1x2x128xf32> to vector<2x128xf32>
    %15 = arith.subf %9, %14 : vector<2x128xf32>
    %c0_i32 = arith.constant 0 : i32
    %16 = arith.cmpi eq, %arg1, %c0_i32 : i32
    %17 = arith.extui %16 : i1 to i32
    %c0_i32_7 = arith.constant 0 : i32
    %18 = arith.cmpi ne, %17, %c0_i32_7 : i32
    scf.if %18 {
      %cst_14 = arith.constant 0.000000e+00 : f32
      %25 = vector.broadcast %cst_14 : f32 to vector<2x128xf32>
      %c0_15 = arith.constant 0 : index
      %c0_16 = arith.constant 0 : index
      %26 = vector.load %arg5[%c0_15, %c0_16] : memref<2x128xf32, #tpu.memory_space<vmem>>, vector<2x128xf32>
      tpu.vector_store %arg5[%c0_15, %c0_16], %25 {strides = array<i32>} : memref<2x128xf32, #tpu.memory_space<vmem>>, vector<2x128xf32>,
    } else {
    }
    %c0_8 = arith.constant 0 : index
    %c0_9 = arith.constant 0 : index
    %19 = vector.load %arg5[%c0_8, %c0_9] : memref<2x128xf32, #tpu.memory_space<vmem>>, vector<2x128xf32>
    %20 = arith.addf %19, %15 : vector<2x128xf32>
    %c0_10 = arith.constant 0 : index
    %c0_11 = arith.constant 0 : index
    %21 = vector.load %arg5[%c0_10, %c0_11] : memref<2x128xf32, #tpu.memory_space<vmem>>, vector<2x128xf32>
    tpu.vector_store %arg5[%c0_10, %c0_11], %20 {strides = array<i32>} : memref<2x128xf32, #tpu.memory_space<vmem>>, vector<2x128xf32>,
    %c0_i32_12 = arith.constant 0 : i32
    %22 = arith.cmpi eq, %arg1, %c0_i32_12 : i32
    %23 = arith.extui %22 : i1 to i32
    %c0_i32_13 = arith.constant 0 : i32
    %24 = arith.cmpi ne, %23, %c0_i32_13 : i32
    scf.if %24 {
      %c0_14 = arith.constant 0 : index
      %c0_15 = arith.constant 0 : index
      %25 = vector.load %arg5[%c0_14, %c0_15] : memref<2x128xf32, #tpu.memory_space<vmem>>, vector<2x128xf32>
      %26 = vector.shape_cast %25 : vector<2x128xf32> to vector<1x2x128xf32>
      %cst_16 = arith.constant dense<0.000000e+00> : vector<1xf32>
      %27 = vector.multi_reduction <add>, %26, %cst_16 [1, 2] : vector<1x2x128xf32> to vector<1xf32>
      %28 = vector.shape_cast %27 : vector<1xf32> to vector<1x1x1xf32>
      %29 = vector.extract %28[0, 0, 0] : f32 from vector<1x1x1xf32>
      %30 = vector.broadcast %29 : f32 to vector<1x1xf32>
      %c0_17 = arith.constant 0 : index
      %c0_18 = arith.constant 0 : index
      %c0_19 = arith.constant 0 : index
      %31 = vector.load %arg4[%c0_17, %c0_18, %c0_19] : memref<1x1x1xf32, #tpu.memory_space<vmem>>, vector<1x1x1xf32>
      %32 = vector.shape_cast %31 : vector<1x1x1xf32> to vector<1x1xf32>
      %33 = vector.shape_cast %30 : vector<1x1xf32> to vector<1x1x1xf32>
      tpu.vector_store %arg4[%c0_17, %c0_18, %c0_19], %33 {strides = array<i32>} : memref<1x1x1xf32, #tpu.memory_space<vmem>>, vector<1x1x1xf32>,
    } else {
    }
    return
  }
  func.func @transform_0(%arg0: i32, %arg1: i32, %arg2: memref<2xi32, #tpu.memory_space<smem>>) -> (i32, i32, i32, i32) {
    %c0_i32 = arith.constant 0 : i32
    %c0_i32_0 = arith.constant 0 : i32
    %c0_i32_1 = arith.constant 0 : i32
    return %arg0, %c0_i32, %arg1, %c0_i32_0 : i32, i32, i32, i32
  }
  func.func @transform_1(%arg0: i32, %arg1: i32, %arg2: memref<2xi32, #tpu.memory_space<smem>>) -> (i32, i32, i32) {
    %c0_i32 = arith.constant 0 : i32
    %c0_i32_0 = arith.constant 0 : i32
    %c0_i32_1 = arith.constant 0 : i32
    return %arg0, %c0_i32, %c0_i32_0 : i32, i32, i32
  }
}

</mosaic_0001>

<bundles_post_ra>
// kernel: cross_entropy_loss.1
= control target key start
LH: loop header
LB: loop body
LE: loop exit
PB: predicated region body
PF: predicated region fallthrough
CT: control target
= control target key end

     0   :  { %s435_s0 = inlined_call_operand.vmem [shape: s32[2], index: 0, kind: input, shape index: {}]   ;;  %s436_s1 = inlined_call_operand.vmem [shape: f32[2,4,2,128], index: 1, kind: input, shape index: {}]   ;;  %s437_s2 = inlined_call_operand.vmem [shape: f32[2,1,1], index: 2, kind: output, shape index: {}]  }
   0x1   :  { %s7_s11 = sshll.u32 %s435_s0, 4  ;;  %s8_s11 = int_to_ptr.vmem [resolvable:$true] %s7_s11 }
   0x2   :  { %s319_s12 = scalar_lea.vmem %s8_s11, 16  ;;  %p324_p1 = scmp.lt.s32.totalorder %s8_s11, %s8_s11 }
   0x3   :  { %p320_p0 = scmp.ne.s32.totalorder %s8_s11, %s319_s12  ;;  %p325_p2 = scmp.lt.s32.totalorder %s319_s12, %s319_s12 }
   0x5   :  { %p326_p3 = por %p325_p2, %p324_p1 }
   0x7   :  { %p327_p4 = pnand %p326_p3, %p320_p0 }
   0x9   :  { %330 = shalt.err (!%p327_p4)  }
   0xa   :  { %s357_s13 = smov [#allocation4]  }
   0xb   :  { %10 = dma.vmem_to_smem %s8_s11, 16, %s357_s13, [#allocation3] }
   0xc   :  { %343 = dma.done.wait [#allocation3], 16 }
   0xd   :  { %344 = vsyncadd [#allocation3], 4294967280 }
   0xe   :  { %12 = sfence }
   0xf   :  { %s377_s14 = smov 0   ;;  %s379_s15 = smov 0  }
  0x10   :  { %s381_s16 = smov 0  }
  0x11 LB: > { %s30_s0 = sadd.s32 1, %s351_s15  ;;  %p274_p5 = scmp.ge.s32.totalorder %s355_s16, 1  ;;  %s355_s16 = sphi %s381_s16, %s18_s16   ;;  %s351_s15 = sphi %s379_s15, %s439_s15   ;;  %s347_s14 = sphi %s377_s14, %s438_s14  }
  0x12   : > { %p32_p6 = scmp.ge.s32.totalorder %s30_s0, 2  ;;  %p111_p7 = scmp.lt.s32.totalorder %s355_s16, 3 }
  0x14   : > { %s441_s0 = smov (%p32_p6, %s30_s0), 0  ;;  %p112_p8 = pnand %p274_p5, %p111_p7 }
  0x15   : > { %p132_p9 = scmp.lt.s32.totalorder (!%p112_p8), %s347_s14, 1  ;;  %v358_v0 = vmov (!%p112_p8), 0.0   ;;  %vm147_vm0 = vcmask (!%p112_p8), 1041408   ;;  %s177_s22 = sld [smem:[#allocation4 + %s347_s14]] (!%p112_p8)  ;;  %vm205_vm1 = vcmask (!%p112_p8), 0  }
  0x16   : > { %115 = sbr.rel (%p112_p8) target bundleno = 297 (0x129), region = 24  ;;  %186 = vst [vmem:[#allocation2] sm:$0x3] (!%p112_p8), %v358_v0 }
  0x1b   : > { %s277_s23 = sshll.u32 (!%p112_p8), %s177_s22, 1 }
  0x1d   : > { %s399_s17 = scalar_select %p132_p9, %s347_s14, 1  ;;  %v187_v35 = vld [vmem:[#allocation2] sm:$0x3] }
  0x1f   : > { %s280_s18 = sshll.u32 %s399_s17, 3  ;;  %s142_s27 = scalar_lea.vmem %s437_s2, %s399_s17 }
  0x20   : > { %s405_s21 = scalar_lea.vmem %s436_s1, %s280_s18 }
  0x21   : > { %v143_v1 = vld [vmem:[%s405_s21] sm:$0x3]  ;;  %v144_v2 = vld [vmem:[%s405_s21 + $0x2] sm:$0x3]  ;;  %v145_v3 = vld [vmem:[%s405_s21 + $0x4] sm:$0x3]  ;;  %s179_s24 = scalar_lea.vmem %s405_s21, %s277_s23 }
  0x22   : > { %v146_v4 = vld [vmem:[%s405_s21 + $0x6] sm:$0x3]  ;;  %v148_v5 = vsel %vm147_vm0, %v143_v1, -inf  ;;  %v149_v6 = vsel %vm147_vm0, %v144_v2, -inf  ;;  %v150_v7 = vsel %vm147_vm0, %v145_v3, -inf }
  0x23   : > { %v151_v8 = vsel %vm147_vm0, %v146_v4, -inf  ;;  %v152_v9 = vmax.f32 %v148_v5, %v149_v6  ;;  %v180_v33 = vld [vmem:[%s179_s24] sm:$0x3] }
  0x24   : > { %v153_v10 = vmax.f32 %v150_v7, %v151_v8 }
  0x26   : > { %v154_v11 = vmax.f32 %v152_v9, %v153_v10 }
  0x28   : > { %v155_v12 = vsub.f32 %v143_v1, %v154_v11  ;;  %v156_v13 = vsub.f32 %v144_v2, %v154_v11  ;;  %v157_v14 = vsub.f32 %v145_v3, %v154_v11  ;;  %v158_v15 = vsub.f32 %v146_v4, %v154_v11 }
  0x2a   : > { %v159_v16 = vmul.f32 1.442695, %v155_v12  ;;  %v161_v17 = vmul.f32 1.442695, %v156_v13  ;;  %v163_v18 = vmul.f32 1.442695, %v157_v14 }
  0x2b   : > { %v165_v19 = vmul.f32 1.442695, %v158_v15 }
  0x2c   : > { %309 = vpow2.f32 %v159_v16 }
  0x2d   : > { %311 = vpow2.f32 %v161_v17 }
  0x2e   : > { %313 = vpow2.f32 %v163_v18 }
  0x2f   : > { %315 = vpow2.f32 %v165_v19 }
  0x36   : > { %v310_v20 = vpop.eup %309 }
  0x37   : > { %v312_v21 = vpop.eup %311  ;;  %v167_v22 = vsel %vm147_vm0, %v310_v20, 0.0 }
  0x38   : > { %v314_v23 = vpop.eup %313  ;;  %v168_v24 = vsel %vm147_vm0, %v312_v21, 0.0 }
  0x39   : > { %v316_v25 = vpop.eup %315  ;;  %v169_v26 = vadd.f32 %v168_v24, %v167_v22  ;;  %v170_v27 = vsel %vm147_vm0, %v314_v23, 0.0 }
  0x3a   : > { %v172_v28 = vsel %vm147_vm0, %v316_v25, 0.0 }
  0x3b   : > { %v171_v29 = vadd.f32 %v170_v27, %v169_v26 }
  0x3d   : > { %v173_v30 = vadd.f32 %v172_v28, %v171_v29 }
  0x3f   : > { %317 = vlog2.f32 %v173_v30 }
  0x49   : > { %v318_v31 = vpop.eup %317 }
  0x4a   : > { %v175_v32 = vmul.f32 0.6931472, %v318_v31 }
  0x4c   : > { %v176_v34 = vadd.f32 %v175_v32, %v154_v11 }
  0x4e   : > { %v181_v36 = vsub.f32 %v176_v34, %v180_v33 }
  0x50   : > { %v188_v37 = vadd.f32 %v187_v35, %v181_v36 }
  0x52   : > { %189 = vst [vmem:[#allocation2] sm:$0x3] %v188_v37 }
  0x59   : > { %v193_v38 = vld [vmem:[#allocation2] sm:$0x3] }
  0x5a   : > { %v194_v39 = vsel %vm147_vm0, %v193_v38, 0.0 }
  0x5b   : > { %195 = vadd.xlane.f32.xlu0 %v194_v39 }
  0xe8   : > { %v196_v40 = vpop.xlane.xlu0 %195 }
  0xe9   : > { %v197_v41 = vrot.slane %v196_v40, 4 }
  0xeb   : > { %v198_v42 = vadd.f32 %v197_v41, %v196_v40 }
  0xed   : > { %v199_v43 = vrot.slane %v198_v42, 2 }
  0xef   : > { %v200_v44 = vadd.f32 %v199_v43, %v198_v42 }
  0xf1   : > { %v201_v45 = vrot.slane %v200_v44, 1 }
  0xf3   : > { %v202_v46 = vadd.f32 %v201_v45, %v200_v44 }
  0xf5   : > { %281 = vpush %v202_v46 }
 0x126   : > { %s282_s28 = spop %281 }
 0x127   : > { %v204_v47 = vstv %s282_s28 }
 0x128   : > { %206 = vst.msk [vmem:[%s142_s27] sm:$0x1] %vm205_vm1, %v204_v47 }
 0x129 PF: > { %s18_s16 = sadd.s32 1, %s355_s16   ;;  %s438_s14 = smov %s351_s15 }
 0x12a   : > { %p15_p10 = scmp.ge.s32.totalorder %s18_s16, 4   ;;  %s439_s15 = smov %s441_s0 }
 0x12c   :  { %17 = sbr.rel (!%p15_p10) target bundleno = 17 (0x11), region = 63 }

</bundles_post_ra>
